<compile_context>
chip_gen: v6e
topology: v6e:2x2x1
jax: 0.10.0
libtpu: 0.0.40
codegen_flags: <defaults>
</compile_context>

<pallas_src>
import jax
import jax.numpy as jnp
from jax.experimental import pallas as pl
from jax.experimental.pallas import tpu as pltpu

_LANE = 128
_SUBLANE = 8
_ROW_TILE = 512            # rows per tile (multiple of 8)
_LANE_TILE = 512           # max lanes per tile (multiple of 128)
_VMEM_LIMIT = 32 * 1024 * 1024


def _make_stats_kernel(valid_rows, tile_rows, ragged, sublane_ok):
    """Phase 0: per-lane sum and sum-of-squares over row tiles.

    valid_rows / tile_rows / ragged / sublane_ok are trace-time Python constants,
    so the masking and accumulation strategy is specialized at lowering time.
    """

    def kernel(x_ref, sum_ref, sq_ref, acc_s, acc_q):
        r = pl.program_id(1)
        x = x_ref[...].astype(jnp.float32)                   # (TR, TL)

        if ragged:
            # Last row tile reads past the array edge (unspecified data); zero it out
            # so it contributes nothing to sum / sumsq.  Cheap VPU select, hidden
            # under the DMA on this mem-bound pass.
            row_ids = r * tile_rows + jax.lax.broadcasted_iota(
                jnp.int32, (tile_rows, 1), 0)
            x = jnp.where(row_ids < valid_rows, x, 0.0)

        if sublane_ok:
            @pl.when(r == 0)
            def _init():
                acc_s[...] = jnp.zeros_like(acc_s)
                acc_q[...] = jnp.zeros_like(acc_q)

            tr, tl = x.shape
            # Fold TR rows into an (8, TL) partial accumulator: pure VPU vreg adds
            # across sublane blocks; the cross-sublane (XLU) fold happens once below.
            xr = x.reshape(tr // _SUBLANE, _SUBLANE, tl)
            acc_s[...] += jnp.sum(xr, axis=0)
            acc_q[...] += jnp.sum(xr * xr, axis=0)

            @pl.when(r == pl.num_programs(1) - 1)
            def _finalize():
                sum_ref[...] = jnp.sum(acc_s[...], axis=0, keepdims=True)
                sq_ref[...] = jnp.sum(acc_q[...], axis=0, keepdims=True)
        else:
            # Single small row tile whose height is not a multiple of 8 (num_r == 1):
            # reduce directly; the scratch accumulators are unused.
            sum_ref[...] = jnp.sum(x, axis=0, keepdims=True)
            sq_ref[...] = jnp.sum(x * x, axis=0, keepdims=True)

    return kernel


def _apply_kernel(x_ref, scale_ref, shift_ref, alpha_ref, o_ref):
    """Phase 1: bn = x*scale + shift;  out = x * (alpha + (1-alpha) * sigmoid(bn))."""
    x = x_ref[...].astype(jnp.float32)
    x_p = jax.nn.sigmoid(x * scale_ref[...] + shift_ref[...])   # sigmoid -> EUP slot
    a = alpha_ref[...]
    o_ref[...] = (x * (a + (1.0 - a) * x_p)).astype(o_ref.dtype)


def _dice_2d(x2, gamma, beta, alpha, eps):
    rows, emb = x2.shape
    out_dtype = x2.dtype

    gamma_f = gamma.reshape(-1).astype(jnp.float32)
    beta_f = beta.reshape(-1).astype(jnp.float32)
    alpha_f = alpha.reshape(-1).astype(jnp.float32)

    # ---- lane densification: fold groups of rows into lanes when E < 128 -------
    g = 1
    if emb < _LANE and _LANE % emb == 0 and rows % (_LANE // emb) == 0:
        g = _LANE // emb
    r_f = rows // g
    l_f = emb * g
    x_f = x2.reshape(r_f, l_f)            # free row-major view

    # ---- tile sizes (lane tile multiple of 128 or full; row tile mult. of 8 or full)
    if l_f > _LANE_TILE and l_f % _LANE == 0:
        tl = max((t for t in (512, 384, 256, 128) if l_f % t == 0), default=_LANE)
    else:
        tl = l_f                          # full lane extent (always legal)
    num_l = pl.cdiv(l_f, tl)

    if r_f > _ROW_TILE:
        tr = _ROW_TILE
    else:
        tr = r_f                          # full row extent (always legal, no pad)
    num_r = pl.cdiv(r_f, tr)
    ragged = (r_f % tr) != 0              # only possible when num_r > 1
    sublane_ok = (tr % _SUBLANE) == 0

    # -------------------- phase 0: per-lane sum / sum of squares ----------------
    s, q = pl.pallas_call(
        _make_stats_kernel(r_f, tr, ragged, sublane_ok),
        out_shape=(jax.ShapeDtypeStruct((1, l_f), jnp.float32),
                   jax.ShapeDtypeStruct((1, l_f), jnp.float32)),
        grid=(num_l, num_r),
        in_specs=[pl.BlockSpec((tr, tl), lambda e, r: (r, e))],
        out_specs=(pl.BlockSpec((1, tl), lambda e, r: (0, e)),
                   pl.BlockSpec((1, tl), lambda e, r: (0, e))),
        scratch_shapes=[pltpu.VMEM((_SUBLANE, tl), jnp.float32),
                        pltpu.VMEM((_SUBLANE, tl), jnp.float32)],
        compiler_params=pltpu.CompilerParams(
            dimension_semantics=("parallel", "arbitrary"),
            vmem_limit_bytes=_VMEM_LIMIT),
    )(x_f)

    # ------------- tiny O(E) fold: fused BatchNorm scale / shift ----------------
    if g > 1:
        s_feat = jnp.sum(s.reshape(g, emb), axis=0)
        q_feat = jnp.sum(q.reshape(g, emb), axis=0)
    else:
        s_feat = s.reshape(emb)
        q_feat = q.reshape(emb)
    n = jnp.float32(rows)
    mean = s_feat / n
    # One-pass (biased) variance combined in f32; clamp tiny negatives from
    # cancellation so rsqrt stays finite and matches the diff-based reference.
    var = jnp.maximum(q_feat / n - mean * mean, 0.0)
    inv = jax.lax.rsqrt(var + jnp.float32(eps))
    scale_f = gamma_f * inv               # BN normalize+affine fused to one FMA
    shift_f = beta_f - mean * scale_f

    def per_lane(v):                      # (emb,) -> (1, l_f) per-lane parameter
        return (jnp.tile(v, g) if g > 1 else v).reshape(1, l_f)

    scale_l = per_lane(scale_f)
    shift_l = per_lane(shift_f)
    alpha_l = per_lane(alpha_f)

    # -------------- phase 1: normalize + sigmoid + adaptive mix -----------------
    out_f = pl.pallas_call(
        _apply_kernel,
        out_shape=jax.ShapeDtypeStruct((r_f, l_f), out_dtype),
        grid=(num_l, num_r),
        in_specs=[pl.BlockSpec((tr, tl), lambda e, r: (r, e)),
                  pl.BlockSpec((1, tl), lambda e, r: (0, e)),
                  pl.BlockSpec((1, tl), lambda e, r: (0, e)),
                  pl.BlockSpec((1, tl), lambda e, r: (0, e))],
        out_specs=pl.BlockSpec((tr, tl), lambda e, r: (r, e)),
        compiler_params=pltpu.CompilerParams(
            dimension_semantics=("parallel", "parallel"),
            vmem_limit_bytes=_VMEM_LIMIT),
    )(x_f, scale_l, shift_l, alpha_l)

    return out_f.reshape(rows, emb)


def dice_forward(x, gamma, beta, alpha, *, dim=2, eps=1e-8):
    """JAX/Pallas equivalent of Dice.forward (training-mode BatchNorm statistics)."""
    # TODO(synk): BatchNorm running-mean/var buffer updates (training side effect)
    # are not modeled; they do not affect the forward output.
    if dim == 2:
        assert x.ndim == 2
        return _dice_2d(x, gamma, beta, alpha, eps)
    else:
        assert x.ndim == 3
        b, f, e = x.shape
        # transpose(1,2) + BatchNorm1d over channel E == normalize the columns of
        # the [B*F, E] reshape; alpha (E,1) in torch is just per-feature alpha[e].
        out2 = _dice_2d(x.reshape(b * f, e), gamma, beta, alpha, eps)
        return out2.reshape(b, f, e)


def _reference(x, gamma, beta, alpha, *, dim=2, eps=1e-8):
    """Pure-JAX reference mirroring the PyTorch forward (training-mode BN)."""
    if dim == 3:
        b, f, e = x.shape
        x2 = x.reshape(b * f, e)
    else:
        x2 = x
    mean = jnp.mean(x2, axis=0, keepdims=True)
    var = jnp.mean((x2 - mean) ** 2, axis=0, keepdims=True)
    bn = (x2 - mean) / jnp.sqrt(var + eps) * gamma + beta
    x_p = jax.nn.sigmoid(bn)
    out2 = alpha * (1.0 - x_p) * x2 + x_p * x2
    return out2.reshape(x.shape)


if __name__ == "__main__":
    key = jax.random.PRNGKey(0)
    k1, k2, k3, k4, k5, k6 = jax.random.split(key, 6)

    emb = 32

    # Parameters, deterministic per nn.Module __init__:
    #   BatchNorm1d: weight (gamma) = ones(emb), bias (beta) = zeros(emb)
    #   alpha = zeros(emb)  (dim=2)  /  zeros(emb, 1) (dim=3, same values)
    gamma = jnp.ones((emb,), jnp.float32)
    beta = jnp.zeros((emb,), jnp.float32)
    alpha = jnp.zeros((emb,), jnp.float32)

    # dim == 2: [batch, emb]   (exercises lane densification: 32 -> 128 lanes)
    x2 = jax.random.normal(k1, (8, emb), jnp.float32)
    out2 = dice_forward(x2, gamma, beta, alpha, dim=2)
    jax.block_until_ready(out2)
    ref2 = _reference(x2, gamma, beta, alpha, dim=2)
    assert jnp.allclose(out2, ref2, atol=1e-5, rtol=1e-5), "dim=2 mismatch"

    # dim == 3: [batch, num_features, emb]
    x3 = jax.random.normal(k2, (2, 4, emb), jnp.float32)
    out3 = dice_forward(x3, gamma, beta, alpha, dim=3)
    jax.block_until_ready(out3)
    ref3 = _reference(x3, gamma, beta, alpha, dim=3)
    assert jnp.allclose(out3, ref3, atol=1e-5, rtol=1e-5), "dim=3 mismatch"

    # Ragged multi-tile case with non-trivial params: rows=523 (> 512, not a multiple
    # of the row tile) exercises the in-kernel mask path with no host-side padding.
    emb_r = 128
    xr = jax.random.normal(k3, (523, emb_r), jnp.float32)
    gamma_r = 1.0 + 0.1 * jax.random.normal(k4, (emb_r,), jnp.float32)
    beta_r = 0.1 * jax.random.normal(k5, (emb_r,), jnp.float32)
    alpha_r = 0.1 * jax.random.normal(k6, (emb_r,), jnp.float32)
    outr = dice_forward(xr, gamma_r, beta_r, alpha_r, dim=2)
    jax.block_until_ready(outr)
    refr = _reference(xr, gamma_r, beta_r, alpha_r, dim=2)
    assert jnp.allclose(outr, refr, atol=1e-4, rtol=1e-4), "ragged mismatch"

    print("KERNEL_OK")
</pallas_src>

<mosaic_0001>
module attributes {stable_mosaic.version = 11 : i64} {
  func.func @kernel(%arg0: i32, %arg1: i32, %arg2: memref<2x128xf32, #tpu.memory_space<vmem>>, %arg3: memref<1x128xf32, #tpu.memory_space<vmem>>, %arg4: memref<1x128xf32, #tpu.memory_space<vmem>>, %arg5: memref<8x128xf32, #tpu.memory_space<vmem>>, %arg6: memref<8x128xf32, #tpu.memory_space<vmem>>) attributes {dimension_semantics = [#tpu.dimension_semantics<parallel>, #tpu.dimension_semantics<arbitrary>], iteration_bounds = array<i64: 1, 1>, scalar_prefetch = 0 : i64, scratch_operands = 2 : i64, tpu.core_type = #tpu.core_type<tc>, window_params = [{transform_indices = @transform_0, window_bounds = array<i64: 2, 128>}, {transform_indices = @transform_1, window_bounds = array<i64: 1, 128>}, {transform_indices = @transform_2, window_bounds = array<i64: 1, 128>}]} {
    %c0 = arith.constant 0 : index
    %c0_0 = arith.constant 0 : index
    %0 = vector.load %arg2[%c0, %c0_0] : memref<2x128xf32, #tpu.memory_space<vmem>>, vector<2x128xf32>
    %cst = arith.constant dense<0.000000e+00> : vector<128xf32>
    %1 = vector.multi_reduction <add>, %0, %cst [0] : vector<2x128xf32> to vector<128xf32>
    %2 = vector.shape_cast %1 : vector<128xf32> to vector<1x128xf32>
    %c0_1 = arith.constant 0 : index
    %c0_2 = arith.constant 0 : index
    %3 = vector.load %arg3[%c0_1, %c0_2] : memref<1x128xf32, #tpu.memory_space<vmem>>, vector<1x128xf32>
    tpu.vector_store %arg3[%c0_1, %c0_2], %2 {strides = array<i32>} : memref<1x128xf32, #tpu.memory_space<vmem>>, vector<1x128xf32>,
    %4 = arith.mulf %0, %0 : vector<2x128xf32>
    %cst_3 = arith.constant dense<0.000000e+00> : vector<128xf32>
    %5 = vector.multi_reduction <add>, %4, %cst_3 [0] : vector<2x128xf32> to vector<128xf32>
    %6 = vector.shape_cast %5 : vector<128xf32> to vector<1x128xf32>
    %c0_4 = arith.constant 0 : index
    %c0_5 = arith.constant 0 : index
    %7 = vector.load %arg4[%c0_4, %c0_5] : memref<1x128xf32, #tpu.memory_space<vmem>>, vector<1x128xf32>
    tpu.vector_store %arg4[%c0_4, %c0_5], %6 {strides = array<i32>} : memref<1x128xf32, #tpu.memory_space<vmem>>, vector<1x128xf32>,
    return
  }
  func.func @transform_0(%arg0: i32, %arg1: i32) -> (i32, i32) {
    %c0_i32 = arith.constant 0 : i32
    return %arg1, %arg0 : i32, i32
  }
  func.func @transform_1(%arg0: i32, %arg1: i32) -> (i32, i32) {
    %c0_i32 = arith.constant 0 : i32
    %c0_i32_0 = arith.constant 0 : i32
    return %c0_i32, %arg0 : i32, i32
  }
  func.func @transform_2(%arg0: i32, %arg1: i32) -> (i32, i32) {
    %c0_i32 = arith.constant 0 : i32
    %c0_i32_0 = arith.constant 0 : i32
    return %c0_i32, %arg0 : i32, i32
  }
}

</mosaic_0001>

<bundles_post_ra>
// kernel: tpu_custom_call.1
= control target key start
LH: loop header
LB: loop body
LE: loop exit
PB: predicated region body
PF: predicated region fallthrough
CT: control target
= control target key end

     0   :  { %8 = vsyncpa [#allocation5], 0  ;;  %s168_s0 = inlined_call_operand.hbm [shape: f32[2,128], index: 0, kind: input, shape index: {}]   ;;  %s169_s1 = inlined_call_operand.hbm [shape: f32[1,128], index: 1, kind: output, shape index: {0}]   ;;  %s170_s2 = inlined_call_operand.hbm [shape: f32[1,128], index: 2, kind: output, shape index: {1}]  }
   0x1   :  { %9 = vsyncpa [#allocation6], 0 }
   0x2   :  { %10 = vsyncpa [#allocation9], 0  ;;  %s141_s9 = smov [#allocation4]  }
   0x3   :  { %s17_s10 = sshll.u32 %s141_s9, 4  ;;  %s18_s10 = int_to_ptr.vmem [resolvable:$true] %s17_s10 }
   0x4   :  { %s83_s11 = scalar_lea.vmem %s18_s10, 32  ;;  %p88_p1 = scmp.lt.s32.totalorder %s18_s10, %s18_s10 }
   0x5   :  { %p84_p0 = scmp.ne.s32.totalorder %s18_s10, %s83_s11  ;;  %p89_p2 = scmp.lt.s32.totalorder %s83_s11, %s83_s11 }
   0x7   :  { %p90_p3 = por %p89_p2, %p88_p1 }
   0x9   :  { %p91_p4 = pnand %p90_p3, %p84_p0 }
   0xb   :  { %94 = shalt.err (!%p91_p4)
}
   0xc   :  { %20 = dma.hbm_to_vmem [thread:$0]  %s168_s0, 32, %s18_s10, [#allocation5]  }
   0xd   :  { %135 = dma.done.wait [#allocation5], 32  }
   0xe   :  { %136 = vsyncadd [#allocation5], 4294967264  ;;  %vm25_vm0 = vcmask 1041408   ;;  %v24_v0 = vld [vmem:[#allocation4] sm:$0x3]  ;;  %s142_s14 = smov [#allocation7]  }
   0xf   :  { %v26_v1 = vsel %vm25_vm0, %v24_v0, 0.0  ;;  %v34_v2 = vmul.f32 %v24_v0, %v24_v0  ;;  %s49_s15 = sshll.u32 %s142_s14, 4  ;;  %s143_s16 = smov [#allocation8]   ;;  %s50_s15 = int_to_ptr.vmem [resolvable:$true] %s49_s15 }
  0x10   :  { %v27_v3 = vrot.slane %v26_v1, 4  ;;  %s59_s0 = sshll.u32 %s143_s16, 4  ;;  %s95_s17 = scalar_lea.vmem %s50_s15, 16  ;;  %s60_s0 = int_to_ptr.vmem [resolvable:$true] %s59_s0 }
  0x11   :  { %v35_v4 = vsel %vm25_vm0, %v34_v2, 0.0  ;;  %p96_p5 = scmp.ne.s32.totalorder %s50_s15, %s95_s17  ;;  %s99_s18 = scalar_lea.vmem %s50_s15, 32 }
  0x12   :  { %v28_v5 = vadd.f32 %v27_v3, %v26_v1  ;;  %v36_v6 = vrot.slane %v35_v4, 4  ;;  %p100_p6 = scmp.lt.s32.totalorder %s50_s15, %s50_s15  ;;  %p101_p7 = scmp.lt.s32.totalorder %s99_s18, %s95_s17 }
  0x14   :  { %v29_v7 = vrot.slane %v28_v5, 2  ;;  %v37_v8 = vadd.f32 %v36_v6, %v35_v4  ;;  %p102_p8 = por %p101_p7, %p100_p6 }
  0x16   :  { %v30_v9 = vadd.f32 %v29_v7, %v28_v5  ;;  %v38_v10 = vrot.slane %v37_v8, 2  ;;  %p103_p9 = pnand %p102_p8, %p96_p5 }
  0x18   :  { %v31_v11 = vrot.slane %v30_v9, 1  ;;  %v39_v12 = vadd.f32 %v38_v10, %v37_v8 }
  0x1a   :  { %v32_v13 = vadd.f32 %v31_v11, %v30_v9  ;;  %v40_v14 = vrot.slane %v39_v12, 1 }
  0x1c   :  { %33 = vst [vmem:[#allocation7] sm:$0x1] %v32_v13  ;;  %v41_v15 = vadd.f32 %v40_v14, %v39_v12 }
  0x1d   :  { %106 = shalt.err (!%p103_p9)
}
  0x1e   :  { %52 = dma.vmem_to_hbm [thread:$0]  %s50_s15, 16, %s169_s1, [#allocation6]   ;;  %42 = vst [vmem:[#allocation8] sm:$0x1] %v41_v15 }
  0x1f   :  { %s115_s21 = scalar_lea.vmem %s60_s0, 16  ;;  %s119_s22 = scalar_lea.vmem %s60_s0, 32 }
  0x20   :  { %p116_p10 = scmp.ne.s32.totalorder %s60_s0, %s115_s21  ;;  %p120_p11 = scmp.lt.s32.totalorder %s60_s0, %s60_s0 }
  0x21   :  { %p121_p12 = scmp.lt.s32.totalorder %s119_s22, %s115_s21 }
  0x23   :  { %p122_p13 = por %p121_p12, %p120_p11 }
  0x25   :  { %p123_p0 = pnand %p122_p13, %p116_p10 }
  0x27   :  { %126 = shalt.err (!%p123_p0)
}
  0x28   :  { %62 = dma.vmem_to_hbm [thread:$0]  %s60_s0, 16, %s170_s2, [#allocation9]  }
  0x29   :  { %137 = dma.done.wait [#allocation6], 16  }
  0x2a   :  { %138 = vsyncadd [#allocation6], 4294967280 }
  0x2b   :  { %139 = dma.done.wait [#allocation9], 16  }
  0x2c   :  { %140 = vsyncadd [#allocation9], 4294967280 }
  0x2d   :  { %69 = vsyncpa [#allocation5], 1 }
  0x2e   :  { %70 = vsyncpa [#allocation6], 1 }
  0x2f   :  { %71 = vsyncpa [#allocation9], 1 }

</bundles_post_ra>
